<compile_context>
chip_gen: v6e
topology: v6e:2x2x1
jax: 0.10.0
libtpu: 0.0.40
codegen_flags: <defaults>
</compile_context>

<pallas_src>
import functools

import jax
import jax.numpy as jnp
from jax.experimental import pallas as pl
from jax.experimental.pallas import tpu as pltpu


# ----------------------------------------------------------------------------
# stem / downsample conv: patchify (host reshape) + tiled matmul+bias kernel
# ----------------------------------------------------------------------------

def _matmul_bias_kernel(x_ref, w_ref, b_ref, o_ref):
    x = x_ref[...].astype(jnp.bfloat16)
    w = w_ref[...].astype(jnp.bfloat16)
    acc = jnp.dot(x, w, preferred_element_type=jnp.float32)
    o_ref[...] = (acc + b_ref[...].astype(jnp.float32)).astype(o_ref.dtype)


def matmul_bias(x, w, b, tm=512):
    """x: (M, K), w: (K, N), b: (1, N) -> (M, N), tiled over M with pipelining."""
    M, K = x.shape
    N = w.shape[1]
    tm = min(tm, M)
    return pl.pallas_call(
        _matmul_bias_kernel,
        grid=(pl.cdiv(M, tm),),
        in_specs=[pl.BlockSpec((tm, K), lambda i: (i, 0)),
                  pl.BlockSpec((K, N), lambda i: (0, 0)),
                  pl.BlockSpec((1, N), lambda i: (0, 0))],
        out_specs=pl.BlockSpec((tm, N), lambda i: (i, 0)),
        out_shape=jax.ShapeDtypeStruct((M, N), jnp.float32),
        compiler_params=pltpu.CompilerParams(dimension_semantics=("parallel",)),
    )(x, w, b)


def _ln_channel_first_kernel(x_ref, w_ref, b_ref, o_ref):
    # Reference "channel-first" LayerNorm: (x - mean) / (sqrt(var) + eps), eps = 1e-6
    x = x_ref[...].astype(jnp.float32)
    mean = jnp.mean(x, axis=-1, keepdims=True)
    var = jnp.mean((x - mean) ** 2, axis=-1, keepdims=True)
    y = (x - mean) / (jnp.sqrt(var) + 1e-6)
    o_ref[...] = (y * w_ref[0] + b_ref[0]).astype(o_ref.dtype)


def ln_channel_first(x2d, w, b, tm=512):
    """x2d: (M, C); equivalent to the channel-first LN of the NCHW reference."""
    M, C = x2d.shape
    tm = min(tm, M)
    return pl.pallas_call(
        _ln_channel_first_kernel,
        grid=(pl.cdiv(M, tm),),
        in_specs=[pl.BlockSpec((tm, C), lambda i: (i, 0)),
                  pl.BlockSpec((1, C), lambda i: (0, 0)),
                  pl.BlockSpec((1, C), lambda i: (0, 0))],
        out_specs=pl.BlockSpec((tm, C), lambda i: (i, 0)),
        out_shape=jax.ShapeDtypeStruct((M, C), jnp.float32),
        compiler_params=pltpu.CompilerParams(dimension_semantics=("parallel",)),
    )(x2d, w, b)


# ----------------------------------------------------------------------------
# Fused ConvNeXtV2-MoE Block kernel (grid over batch)
# ----------------------------------------------------------------------------

def _block_kernel(x_ref, dww_ref, dwb_ref, lnw_ref, lnb_ref,
                  gwt_ref, gb_ref, noise_ref, ew_ref, eb_ref,
                  ws_ref, wa_ref, bf_ref,
                  y_ref, gp_ref):
    _, H, W, C = x_ref.shape
    Ce = 2 * C
    HW = H * W

    x = x_ref[0].astype(jnp.float32)                   # (H, W, C); also the residual

    # Zero-pad (3,3) in-kernel via concatenation -> no HBM pad round-trip per block.
    zw = jnp.zeros((H, 3, C), jnp.float32)
    zh = jnp.zeros((3, W + 6, C), jnp.float32)
    xpad = jnp.concatenate(
        [zh, jnp.concatenate([zw, x, zw], axis=1), zh], axis=0)   # (H+6, W+6, C)

    # --- depthwise 7x7 conv: keep each kh band resident, shift along W for kw ---
    # TODO(synk): for full-size models add an H-row grid axis (vreg-resident acc,
    # two-pass GRN) so the block also fits v7x's 64 MiB VMEM.
    acc = jnp.zeros((H, W, C), jnp.float32)
    for kh in range(7):
        band = xpad[kh:kh + H]                         # (H, W+6, C)
        for kw in range(7):
            acc = acc + band[:, kw:kw + W, :] * dww_ref[kh, kw, :].astype(jnp.float32)
    xdw = (acc + dwb_ref[0].astype(jnp.float32)).reshape(HW, C)

    # --- nn.LayerNorm (channel-last, eps = 1e-5) ---
    mean = jnp.mean(xdw, axis=-1, keepdims=True)
    var = jnp.mean((xdw - mean) ** 2, axis=-1, keepdims=True)
    xln = (xdw - mean) * jax.lax.rsqrt(var + 1e-5) * lnw_ref[0] + lnb_ref[0]

    # --- MoE gate: two dot-products on the VPU (an N=2 matmul would waste the MXU) ---
    gwt = gwt_ref[...].astype(jnp.float32)             # (2, C)
    gb = gb_ref[...].astype(jnp.float32)               # (1, 2)
    noise = noise_ref[0].astype(jnp.float32)           # (HW, 2), host-generated randn*std
    l0 = jnp.sum(xln * gwt[0:1, :], axis=-1, keepdims=True) + gb[:, 0:1]
    l1 = jnp.sum(xln * gwt[1:2, :], axis=-1, keepdims=True) + gb[:, 1:2]
    z0 = l0 + noise[:, 0:1]
    z1 = l1 + noise[:, 1:2]

    # softmax over 2 experts (numerically-stable sigmoid form)
    p1 = jax.nn.sigmoid(z1 - z0)
    p0 = 1.0 - p1
    # Spatially reduced gate probs (the wrapper only needs their mean) -> tiny output.
    probs2 = jnp.concatenate([p0, p1], axis=1)          # (HW, 2)
    gp_ref[0] = jnp.sum(probs2, axis=0, keepdims=True)  # (1, 2)

    sel1 = p1 > p0                                      # top-1 index; ties -> expert 0
    top_p = jnp.maximum(p0, p1)

    # --- both experts in a single fused MXU matmul (bf16 operands, f32 accumulate) ---
    e = (jnp.dot(xln.astype(jnp.bfloat16), ew_ref[...],
                 preferred_element_type=jnp.float32)
         + eb_ref[0].astype(jnp.float32))               # (HW, 4C) = [e0 | e1]
    half = top_p * jnp.where(sel1, e[:, Ce:], e[:, :Ce])  # (HW, 2C)

    # The MoE output is [half, half] (repeat by num_experts).  QuickGELU and the GRN
    # normalizer act identically on both copies, so compute them once on `half`.
    # gamma/beta/pwconv2 were folded on the host into ws/wa/bf so that
    #   y = scaled @ ws + act @ wa + bf  ==  pwconv2(GRN(QuickGELU([half, half]))).
    act = half * jax.nn.sigmoid(1.702 * half)                    # QuickGELU
    gx = jnp.sqrt(jnp.sum(act * act, axis=0, keepdims=True))     # (1, 2C) L2 over space
    nx = gx / (jnp.mean(gx, axis=-1, keepdims=True) + 1e-6)
    scaled = act * nx

    y = (jnp.dot(scaled.astype(jnp.bfloat16), ws_ref[...],
                 preferred_element_type=jnp.float32)
         + jnp.dot(act.astype(jnp.bfloat16), wa_ref[...],
                   preferred_element_type=jnp.float32)
         + bf_ref[0].astype(jnp.float32))

    # TODO(synk): DropPath is treated as eval-mode identity (stochastic depth not modeled).
    y_ref[0] = (x + y.reshape(H, W, C)).astype(y_ref.dtype)


def block_forward(x, p, noise, noise_std=0.1):
    """x: (N, H, W, C) NHWC, noise: (N, H*W, 2) ~ N(0, noise_std^2).

    Returns (y, per-image gate-prob sums (N, 1, 2))."""
    N, H, W, C = x.shape
    Ce = 2 * C
    HW = H * W
    del noise_std  # noise is pre-scaled on the host

    # Host-side parameter folding (tiny; constant work per call).
    gwt = p["gate_w"].T                                                    # (2, C)
    ew = jnp.concatenate([p["e0_w"], p["e1_w"]], axis=1).astype(jnp.bfloat16)  # (C, 4C)
    eb = jnp.concatenate([p["e0_b"], p["e1_b"]], axis=1)                   # (1, 4C)
    gamma, beta = p["grn_gamma"], p["grn_beta"]                            # (1, 4C)
    pww, pwb = p["pw2_w"], p["pw2_b"]                                      # (4C, C), (1, C)
    ws = (gamma[:, :Ce].T * pww[:Ce] + gamma[:, Ce:].T * pww[Ce:]).astype(jnp.bfloat16)
    wa = (pww[:Ce] + pww[Ce:]).astype(jnp.bfloat16)
    bf = beta[:, :Ce] @ pww[:Ce] + beta[:, Ce:] @ pww[Ce:] + pwb           # (1, C)

    def full(shape):
        nd = len(shape)
        return pl.BlockSpec(shape, lambda n, _nd=nd: (0,) * _nd)

    in_specs = [
        pl.BlockSpec((1, H, W, C), lambda n: (n, 0, 0, 0)),      # x
        full((7, 7, C)), full((1, C)),                           # dwconv w/b
        full((1, C)), full((1, C)),                              # layernorm w/b
        full((2, C)), full((1, 2)),                              # gate w^T / b
        pl.BlockSpec((1, HW, 2), lambda n: (n, 0, 0)),           # gate noise
        full((C, 4 * C)), full((1, 4 * C)),                      # fused experts w/b
        full((Ce, C)), full((Ce, C)), full((1, C)),              # folded pwconv2
    ]
    out_specs = [
        pl.BlockSpec((1, H, W, C), lambda n: (n, 0, 0, 0)),
        pl.BlockSpec((1, 1, 2), lambda n: (n, 0, 0)),
    ]
    y, gp_sum = pl.pallas_call(
        _block_kernel,
        grid=(N,),
        in_specs=in_specs,
        out_specs=out_specs,
        out_shape=[
            jax.ShapeDtypeStruct((N, H, W, C), jnp.float32),
            jax.ShapeDtypeStruct((N, 1, 2), jnp.float32),
        ],
        compiler_params=pltpu.CompilerParams(dimension_semantics=("parallel",)),
    )(x, p["dw_w"], p["dw_b"], p["ln_w"], p["ln_b"],
      gwt, p["gate_b"], noise, ew, eb, ws, wa, bf)
    return y, gp_sum


# ----------------------------------------------------------------------------
# Head: avgpool + nn.LayerNorm + MoE(num_experts=1, topk=1)
# ----------------------------------------------------------------------------

def _head_kernel(x_ref, lnw_ref, lnb_ref, gw_ref, gb_ref, noise_ref, ew_ref, eb_ref,
                 out_ref, gp_ref):
    N, H, W, C = x_ref.shape
    x = x_ref[...].astype(jnp.float32).reshape(N, H * W, C)
    pooled = jnp.mean(x, axis=1)                            # AdaptiveAvgPool2d((1,1))
    mean = jnp.mean(pooled, axis=-1, keepdims=True)
    var = jnp.mean((pooled - mean) ** 2, axis=-1, keepdims=True)
    xln = (pooled - mean) * jax.lax.rsqrt(var + 1e-5) * lnw_ref[0] + lnb_ref[0]

    logits = (jnp.dot(xln, gw_ref[...].astype(jnp.float32),
                      preferred_element_type=jnp.float32)
              + gb_ref[0] + noise_ref[...].astype(jnp.float32))
    mx = jnp.max(logits, axis=-1, keepdims=True)
    ex = jnp.exp(logits - mx)
    probs = ex / jnp.sum(ex, axis=-1, keepdims=True)        # single expert -> exactly 1
    gp_ref[...] = probs

    eo = jnp.dot(xln, ew_ref[...].astype(jnp.float32),
                 preferred_element_type=jnp.float32) + eb_ref[0]
    out_ref[...] = (probs[:, 0:1] * eo).astype(out_ref.dtype)


# ----------------------------------------------------------------------------
# Parameters (deterministic synthetic init; shapes match the PyTorch __init__)
# ----------------------------------------------------------------------------

def init_params(key, in_chans, dims, depths, num_classes):
    keys = iter(jax.random.split(key, 1024))

    def nrm(shape, scale=0.05):
        return jax.random.normal(next(keys), shape, jnp.float32) * scale

    params = {
        "stem_w": nrm((4 * 4 * in_chans, dims[0])),      # flattened (kh, kw, cin) x cout
        "stem_b": nrm((1, dims[0])),
        "stem_ln_w": jnp.ones((1, dims[0]), jnp.float32) + nrm((1, dims[0])),
        "stem_ln_b": nrm((1, dims[0])),
        "ds": [],
        "stages": [],
    }
    for i in range(3):
        params["ds"].append({
            "ln_w": jnp.ones((1, dims[i]), jnp.float32) + nrm((1, dims[i])),
            "ln_b": nrm((1, dims[i])),
            "conv_w": nrm((2 * 2 * dims[i], dims[i + 1])),
            "conv_b": nrm((1, dims[i + 1])),
        })
    for i in range(4):
        C = dims[i]
        blocks = []
        for _ in range(depths[i]):
            blocks.append({
                "dw_w": nrm((7, 7, C)),
                "dw_b": nrm((1, C)),
                "ln_w": jnp.ones((1, C), jnp.float32) + nrm((1, C)),
                "ln_b": nrm((1, C)),
                "gate_w": nrm((C, 2)),
                "gate_b": nrm((1, 2)),
                "e0_w": nrm((C, 2 * C)),          # xavier-ish; biases zero as in __init__
                "e0_b": jnp.zeros((1, 2 * C), jnp.float32),
                "e1_w": nrm((C, 2 * C)),
                "e1_b": jnp.zeros((1, 2 * C), jnp.float32),
                "grn_gamma": nrm((1, 4 * C)),
                "grn_beta": nrm((1, 4 * C)),
                "pw2_w": nrm((4 * C, C)),
                "pw2_b": nrm((1, C)),
            })
        params["stages"].append(blocks)
    D = dims[3]
    params["head_ln_w"] = jnp.ones((1, D), jnp.float32) + nrm((1, D))
    params["head_ln_b"] = nrm((1, D))
    params["fc_gate_w"] = nrm((D, 1))
    params["fc_gate_b"] = nrm((1, 1))
    params["fc_e_w"] = nrm((D, num_classes))
    params["fc_e_b"] = jnp.zeros((1, num_classes), jnp.float32)
    return params


# ----------------------------------------------------------------------------
# Full forward pass
# ----------------------------------------------------------------------------

def convnextv2_moe_forward(x_nchw, params, noise_key, dims, depths,
                           num_classes, noise_std=0.1):
    x = jnp.transpose(x_nchw, (0, 2, 3, 1)).astype(jnp.float32)   # NCHW -> NHWC
    N = x.shape[0]
    lb_losses = []

    n_blocks = sum(depths)
    all_keys = jax.random.split(noise_key, n_blocks + 1)
    blk_keys, head_key = all_keys[:n_blocks], all_keys[n_blocks]
    blk_idx = 0

    def patchify(t, k):
        n_, h_, w_, c_ = t.shape
        t = t.reshape(n_, h_ // k, k, w_ // k, k, c_)
        t = jnp.transpose(t, (0, 1, 3, 2, 4, 5))
        return t.reshape(n_ * (h_ // k) * (w_ // k), k * k * c_), (n_, h_ // k, w_ // k)

    # --- stem: 4x4 stride-4 conv + channel-first LayerNorm ---
    patches, (n_, h_, w_) = patchify(x, 4)
    x = matmul_bias(patches, params["stem_w"], params["stem_b"])
    x = ln_channel_first(x, params["stem_ln_w"], params["stem_ln_b"])
    x = x.reshape(n_, h_, w_, dims[0])

    for i in range(4):
        if i > 0:
            ds = params["ds"][i - 1]
            n_, h_, w_, c_ = x.shape
            xf = ln_channel_first(x.reshape(-1, c_), ds["ln_w"], ds["ln_b"]).reshape(n_, h_, w_, c_)
            patches, (n_, h_, w_) = patchify(xf, 2)
            x = matmul_bias(patches, ds["conv_w"], ds["conv_b"]).reshape(n_, h_, w_, dims[i])
        for blk in params["stages"][i]:
            nb, hb, wb, _ = x.shape
            tokens = nb * hb * wb
            # Host-generated gate noise (matches torch.randn_like * noise_std).
            noise = jax.random.normal(
                blk_keys[blk_idx], (nb, hb * wb, 2), jnp.float32) * noise_std
            x, gp_sum = block_forward(x, blk, noise, noise_std)
            blk_idx += 1
            gpm = jnp.sum(gp_sum, axis=(0, 1)) / tokens           # mean prob per expert
            lb_losses.append(jnp.mean((gpm - 0.5) ** 2) * 2.0)

    # --- head: avgpool + LayerNorm + MoE(num_experts=1) ---
    fc_noise = jax.random.normal(head_key, (N, 1), jnp.float32) * noise_std
    logits, fc_gp = pl.pallas_call(
        _head_kernel,
        out_shape=[
            jax.ShapeDtypeStruct((N, num_classes), jnp.float32),
            jax.ShapeDtypeStruct((N, 1), jnp.float32),
        ],
    )(x, params["head_ln_w"], params["head_ln_b"], params["fc_gate_w"],
      params["fc_gate_b"], fc_noise, params["fc_e_w"], params["fc_e_b"])
    gpm = jnp.mean(fc_gp, axis=0)
    lb_losses.append(jnp.mean((gpm - 1.0) ** 2) * 1.0)

    total_lb_loss = jnp.mean(jnp.stack(lb_losses))
    return logits, total_lb_loss


# ----------------------------------------------------------------------------
# Main
# ----------------------------------------------------------------------------

if __name__ == "__main__":
    key = jax.random.PRNGKey(0)
    pkey, xkey, nkey = jax.random.split(key, 3)

    in_chans = 3
    dims = [8, 16, 32, 64]          # small synthetic config (default is [96,192,384,768])
    depths = [1, 1, 1, 1]
    num_classes = 10

    params = init_params(pkey, in_chans, dims, depths, num_classes)
    x = jax.random.normal(xkey, (2, in_chans, 32, 32), jnp.float32)   # NCHW, like PyTorch

    logits, lb_loss = convnextv2_moe_forward(x, params, nkey, dims, depths, num_classes)
    jax.block_until_ready((logits, lb_loss))

    assert logits.shape == (2, num_classes)
    assert lb_loss.shape == ()
    assert bool(jnp.all(jnp.isfinite(logits))) and bool(jnp.isfinite(lb_loss))
    print("KERNEL_OK")
</pallas_src>

<mosaic_0001>
module attributes {stable_mosaic.version = 11 : i64} {
  func.func @_matmul_bias_kernel(%arg0: i32, %arg1: memref<128x48xf32, #tpu.memory_space<vmem>>, %arg2: memref<48x8xf32, #tpu.memory_space<vmem>>, %arg3: memref<1x8xf32, #tpu.memory_space<vmem>>, %arg4: memref<128x8xf32, #tpu.memory_space<vmem>>) attributes {dimension_semantics = [#tpu.dimension_semantics<parallel>], iteration_bounds = array<i64: 1>, scalar_prefetch = 0 : i64, scratch_operands = 0 : i64, tpu.core_type = #tpu.core_type<tc>, window_params = [{transform_indices = @transform_0, window_bounds = array<i64: 128, 48>}, {pipeline_mode = #tpu.pipeline_mode<synchronous>, transform_indices = @transform_1, window_bounds = array<i64: 48, 8>}, {pipeline_mode = #tpu.pipeline_mode<synchronous>, transform_indices = @transform_2, window_bounds = array<i64: 1, 8>}, {transform_indices = @transform_3, window_bounds = array<i64: 128, 8>}]} {
    %c0 = arith.constant 0 : index
    %c0_0 = arith.constant 0 : index
    %0 = vector.load %arg1[%c0, %c0_0] : memref<128x48xf32, #tpu.memory_space<vmem>>, vector<128x48xf32>
    %1 = arith.truncf %0 : vector<128x48xf32> to vector<128x48xbf16>
    %c0_1 = arith.constant 0 : index
    %c0_2 = arith.constant 0 : index
    %2 = vector.load %arg2[%c0_1, %c0_2] : memref<48x8xf32, #tpu.memory_space<vmem>>, vector<48x8xf32>
    %3 = arith.truncf %2 : vector<48x8xf32> to vector<48x8xbf16>
    %cst = arith.constant dense<0.000000e+00> : vector<128x8xf32>
    %4 = tpu.matmul %1, %3, %cst {dimension_numbers = #tpu.dot_dimension_numbers<[1], [0], [0], [1], [0, 0, 1, 1], [], []>} : vector<128x48xbf16>, vector<48x8xbf16>, vector<128x8xf32> -> vector<128x8xf32>
    %c0_3 = arith.constant 0 : index
    %c0_4 = arith.constant 0 : index
    %5 = vector.load %arg3[%c0_3, %c0_4] : memref<1x8xf32, #tpu.memory_space<vmem>>, vector<1x8xf32>
    %6 = vector.broadcast %5 : vector<1x8xf32> to vector<128x8xf32>
    %7 = arith.addf %4, %6 : vector<128x8xf32>
    %c0_5 = arith.constant 0 : index
    %c0_6 = arith.constant 0 : index
    %8 = vector.load %arg4[%c0_5, %c0_6] : memref<128x8xf32, #tpu.memory_space<vmem>>, vector<128x8xf32>
    tpu.vector_store %arg4[%c0_5, %c0_6], %7 {strides = array<i32>} : memref<128x8xf32, #tpu.memory_space<vmem>>, vector<128x8xf32>,
    return
  }
  func.func @transform_0(%arg0: i32) -> (i32, i32) {
    %c0_i32 = arith.constant 0 : i32
    %c0_i32_0 = arith.constant 0 : i32
    return %arg0, %c0_i32 : i32, i32
  }
  func.func @transform_1(%arg0: i32) -> (i32, i32) {
    %c0_i32 = arith.constant 0 : i32
    %c0_i32_0 = arith.constant 0 : i32
    %c0_i32_1 = arith.constant 0 : i32
    return %c0_i32, %c0_i32_0 : i32, i32
  }
  func.func @transform_2(%arg0: i32) -> (i32, i32) {
    %c0_i32 = arith.constant 0 : i32
    %c0_i32_0 = arith.constant 0 : i32
    %c0_i32_1 = arith.constant 0 : i32
    return %c0_i32, %c0_i32_0 : i32, i32
  }
  func.func @transform_3(%arg0: i32) -> (i32, i32) {
    %c0_i32 = arith.constant 0 : i32
    %c0_i32_0 = arith.constant 0 : i32
    return %arg0, %c0_i32 : i32, i32
  }
}

</mosaic_0001>

<bundles_post_ra>
// kernel: tpu_custom_call.1
= control target key start
LH: loop header
LB: loop body
LE: loop exit
PB: predicated region body
PF: predicated region fallthrough
CT: control target
= control target key end

     0   :  { %vm55_vm0 = vcmask 392192   ;;  %vm177_vm1 = vcmask 64512   ;;  %s407_s1 = inlined_call_operand.vmem [shape: f32[48,8], index: 1, kind: input, shape index: {}]   ;;  %s408_s0 = inlined_call_operand.vmem [shape: f32[128,48], index: 0, kind: input, shape index: {}]   ;;  %s409_s2 = inlined_call_operand.vmem [shape: f32[1,8], index: 2, kind: input, shape index: {}]   ;;  %s410_s3 = inlined_call_operand.vmem [shape: f32[128,8], index: 3, kind: output, shape index: {}]  }
   0x1   :  { %v43_v0 = vld [vmem:[%s407_s1 + $0x20] sm:$0xff]  ;;  %v44_v1 = vld [vmem:[%s407_s1 + $0x28] sm:$0xff]  ;;  %v41_v2 = vld [vmem:[%s407_s1 + $0x10] sm:$0xff] }
   0x2   :  { %v47_v3 = vpack.c.bf16 %v44_v1, %v43_v0  ;;  %v42_v4 = vld [vmem:[%s407_s1 + $0x18] sm:$0xff]  ;;  %v39_v5 = vld [vmem:[%s407_s1] sm:$0xff]  ;;  %v40_v6 = vld [vmem:[%s407_s1 + $0x8] sm:$0xff] }
   0x3   :  { %v46_v7 = vpack.c.bf16 %v42_v4, %v41_v2  ;;  %v15_v8 = vld [vmem:[%s408_s0] sm:$0xff]  ;;  %v16_v9 = vld [vmem:[%s408_s0 + $0x8] sm:$0xff]  ;;  %v45_v14 = vpack.c.bf16 %v40_v6, %v39_v5  ;;  %v17_v15 = vld [vmem:[%s408_s0 + $0x10] sm:$0xff] }
   0x4   :  { %v23_v10 = vld [vmem:[%s408_s0 + $0x40] sm:$0xff]  ;;  %218 = vmatprep.subr.bf16.mxu0 %v47_v3  ;;  %240 = vmatprep.subr.bf16.mxu1 %v47_v3  ;;  %v31_v11 = vpack.c.bf16 %v16_v9, %v15_v8  ;;  %v24_v12 = vld [vmem:[%s408_s0 + $0x48] sm:$0xff]  ;;  %v18_v16 = vld [vmem:[%s408_s0 + $0x18] sm:$0xff] }
   0x5   :  { %219 = vmatpush3.bf16.msra.mxu0 %v47_v3  ;;  %243 = vmatpush3.bf16.msra.mxu1 %v47_v3  ;;  %v35_v13 = vpack.c.bf16 %v24_v12, %v23_v10  ;;  %v25_v17 = vld [vmem:[%s408_s0 + $0x50] sm:$0xff]  ;;  %v26_v18 = vld [vmem:[%s408_s0 + $0x58] sm:$0xff]  ;;  %v19_v19 = vld [vmem:[%s408_s0 + $0x20] sm:$0xff]  ;;  %v32_v23 = vpack.c.bf16 %v18_v16, %v17_v15 }
   0x6   :  { %220 = vmatprep.subr.bf16.mxu0 %v46_v7  ;;  %241 = vmatprep.subr.bf16.mxu1 %v46_v7  ;;  %v20_v20 = vld [vmem:[%s408_s0 + $0x28] sm:$0xff]  ;;  %v27_v21 = vld [vmem:[%s408_s0 + $0x60] sm:$0xff]  ;;  %v36_v24 = vpack.c.bf16 %v26_v18, %v25_v17  ;;  %v21_v27 = vld [vmem:[%s408_s0 + $0x30] sm:$0xff] }
   0x7   :  { %224 = vmatprep.mubr.msk.bf16.mxu0 %vm55_vm0, %v31_v11  ;;  %232 = vmatprep.mubr.msk.bf16.mxu1 %vm55_vm0, %v35_v13  ;;  %v28_v22 = vld [vmem:[%s408_s0 + $0x68] sm:$0xff]  ;;  %v33_v25 = vpack.c.bf16 %v20_v20, %v19_v19  ;;  %v22_v28 = vld [vmem:[%s408_s0 + $0x38] sm:$0xff]  ;;  %v29_v29 = vld [vmem:[%s408_s0 + $0x70] sm:$0xff] }
   0x8   :  { %v37_v26 = vpack.c.bf16 %v28_v22, %v27_v21  ;;  %v30_v30 = vld [vmem:[%s408_s0 + $0x78] sm:$0xff]  ;;  %v34_v31 = vpack.c.bf16 %v22_v28, %v21_v27  ;;  %v198_v33 = vld [vmem:[%s409_s2] ss:$0 sm:$0xff] }
   0x9   :  { %221 = vmatpush3.bf16.msra.mxu0 %v46_v7  ;;  %244 = vmatpush3.bf16.msra.mxu1 %v46_v7  ;;  %v38_v32 = vpack.c.bf16 %v30_v30, %v29_v29 }
   0xa   :  { %222 = vmatprep.subr.bf16.mxu0 %v45_v14  ;;  %242 = vmatprep.subr.bf16.mxu1 %v45_v14 }
   0xd   :  { %223 = vmatpush3.bf16.msra.mxu0 %v45_v14  ;;  %245 = vmatpush3.bf16.msra.mxu1 %v45_v14 }
  0x10   :  { %225 = vmatmul.mubr.msk.bf16.vlgmr.msra.gmra.mxu0 %vm55_vm0, %v32_v23  ;;  %233 = vmatmul.mubr.msk.bf16.vlgmr.msra.gmra.mxu1 %vm55_vm0, %v36_v24 }
  0x11   :  { %228 = vmatprep.mubr.msk.bf16.mxu0 %vm55_vm0, %v33_v25  ;;  %236 = vmatprep.mubr.msk.bf16.mxu1 %vm55_vm0, %v37_v26 }
  0x18   :  { %229 = vmatmul.mubr.msk.bf16.gmra.mxu0 %vm55_vm0, %v34_v31  ;;  %237 = vmatmul.mubr.msk.bf16.gmra.mxu1 %vm55_vm0, %v38_v32 }
  0xd0   :  { %v226_v34 = vpop.f32.mrf.mxu0  ;;  %v234_v35 = vpop.f32.mrf.mxu1 }
  0xd1   :  { %v123_v36 = vadd.f32 %v226_v34, %v198_v33  ;;  %v155_v37 = vadd.f32 %v234_v35, %v198_v33 }
  0xd2   :  { %v114_v38 = vpop.f32.mrf.mxu0  ;;  %v146_v39 = vpop.f32.mrf.mxu1 }
  0xd3   :  { %180 = vst.msk [vmem:[%s410_s3 + $0x10] sm:$0xff] %vm177_vm1, %v123_v36  ;;  %188 = vst.msk [vmem:[%s410_s3 + $0x50] sm:$0xff] %vm177_vm1, %v155_v37  ;;  %v115_v40 = vadd.f32 %v198_v33, %v114_v38  ;;  %v147_v41 = vadd.f32 %v198_v33, %v146_v39 }
  0xd4   :  { %v227_v42 = vpop.f32.mrf.mxu0  ;;  %v235_v43 = vpop.f32.mrf.mxu1 }
  0xd5   :  { %178 = vst.msk [vmem:[%s410_s3] sm:$0xff] %vm177_vm1, %v115_v40  ;;  %186 = vst.msk [vmem:[%s410_s3 + $0x40] sm:$0xff] %vm177_vm1, %v147_v41  ;;  %v126_v44 = vadd.f32 %v227_v42, %v198_v33  ;;  %v158_v45 = vadd.f32 %v235_v43, %v198_v33 }
  0xd6   :  { %v117_v46 = vpop.f32.mrf.mxu0  ;;  %v149_v47 = vpop.f32.mrf.mxu1 }
  0xd7   :  { %181 = vst.msk [vmem:[%s410_s3 + $0x18] sm:$0xff] %vm177_vm1, %v126_v44  ;;  %189 = vst.msk [vmem:[%s410_s3 + $0x58] sm:$0xff] %vm177_vm1, %v158_v45  ;;  %v118_v48 = vadd.f32 %v198_v33, %v117_v46  ;;  %v150_v49 = vadd.f32 %v198_v33, %v149_v47 }
  0xd8   :  { %v230_v50 = vpop.f32.mrf.mxu0  ;;  %v238_v51 = vpop.f32.mrf.mxu1 }
  0xd9   :  { %179 = vst.msk [vmem:[%s410_s3 + $0x8] sm:$0xff] %vm177_vm1, %v118_v48  ;;  %187 = vst.msk [vmem:[%s410_s3 + $0x48] sm:$0xff] %vm177_vm1, %v150_v49  ;;  %v139_v52 = vadd.f32 %v230_v50, %v198_v33  ;;  %v171_v53 = vadd.f32 %v238_v51, %v198_v33 }
  0xda   :  { %v130_v54 = vpop.f32.mrf.mxu0  ;;  %v162_v55 = vpop.f32.mrf.mxu1 }
  0xdb   :  { %184 = vst.msk [vmem:[%s410_s3 + $0x30] sm:$0xff] %vm177_vm1, %v139_v52  ;;  %192 = vst.msk [vmem:[%s410_s3 + $0x70] sm:$0xff] %vm177_vm1, %v171_v53  ;;  %v131_v56 = vadd.f32 %v198_v33, %v130_v54  ;;  %v163_v57 = vadd.f32 %v198_v33, %v162_v55 }
  0xdc   :  { %v231_v58 = vpop.f32.mrf.mxu0  ;;  %v239_v59 = vpop.f32.mrf.mxu1 }
  0xdd   :  { %182 = vst.msk [vmem:[%s410_s3 + $0x20] sm:$0xff] %vm177_vm1, %v131_v56  ;;  %190 = vst.msk [vmem:[%s410_s3 + $0x60] sm:$0xff] %vm177_vm1, %v163_v57  ;;  %v142_v60 = vadd.f32 %v231_v58, %v198_v33  ;;  %v174_v61 = vadd.f32 %v239_v59, %v198_v33 }
  0xde   :  { %v133_v62 = vpop.f32.mrf.mxu0  ;;  %v165_v63 = vpop.f32.mrf.mxu1 }
  0xdf   :  { %185 = vst.msk [vmem:[%s410_s3 + $0x38] sm:$0xff] %vm177_vm1, %v142_v60  ;;  %193 = vst.msk [vmem:[%s410_s3 + $0x78] sm:$0xff] %vm177_vm1, %v174_v61  ;;  %v134_v0 = vadd.f32 %v198_v33, %v133_v62  ;;  %v166_v1 = vadd.f32 %v198_v33, %v165_v63 }
  0xe1   :  { %183 = vst.msk [vmem:[%s410_s3 + $0x28] sm:$0xff] %vm177_vm1, %v134_v0  ;;  %191 = vst.msk [vmem:[%s410_s3 + $0x68] sm:$0xff] %vm177_vm1, %v166_v1 }

</bundles_post_ra>
